<compile_context>
chip_gen: v6e
topology: v6e:2x2x1
jax: 0.10.0
libtpu: 0.0.40
codegen_flags: <defaults>
</compile_context>

<pallas_src>
import functools

import jax
import jax.numpy as jnp
from jax import lax
from jax.experimental import pallas as pl
from jax.experimental.pallas import tpu as pltpu

IN_DIM = 28 * 28   # 784
H1 = 128
H2 = 64
OUT_DIM = 10
OUT_PAD = 128      # lane-dense padded output width
MAX_TB = 1024      # batch tile cap: bf16 x tile 1.57 MiB (x2 buffered) fits every gen
NEG_BIG = -1e30    # "minus infinity" for masked pad logits


def _round_up(n, m):
    return (n + m - 1) // m * m


def mlp_kernel(x_ref, w1_ref, b1_ref, w2_ref, b2_ref, w3_ref, b3_ref, o_ref):
    # x / w* are bf16; bias add, ReLU, log_softmax and MXU accumulation are f32.
    x = x_ref[...]

    # Layer 1: Linear(784 -> 128) + ReLU   (MXU, f32 accumulate)
    h1 = jnp.dot(x, w1_ref[...], preferred_element_type=jnp.float32) + b1_ref[...]
    h1 = jnp.maximum(h1, 0.0)

    # Layer 2: Linear(128 -> 64) + ReLU
    h2 = jnp.dot(h1.astype(jnp.bfloat16), w2_ref[...],
                 preferred_element_type=jnp.float32) + b2_ref[...]
    h2 = jnp.maximum(h2, 0.0)

    # Layer 3: Linear(64 -> 128 padded), no activation
    logits = jnp.dot(h2.astype(jnp.bfloat16), w3_ref[...],
                     preferred_element_type=jnp.float32) + b3_ref[...]

    # Mask padded logit columns so they do not perturb the log_softmax.
    col = lax.broadcasted_iota(jnp.int32, logits.shape, 1)
    logits = jnp.where(col < OUT_DIM, logits, jnp.float32(NEG_BIG))

    # log_softmax along dim=1 (numerically stable)
    m = jnp.max(logits, axis=1, keepdims=True)
    shifted = logits - m
    lse = jnp.log(jnp.sum(jnp.exp(shifted), axis=1, keepdims=True))
    o_ref[...] = (shifted - lse).astype(o_ref.dtype)


@jax.jit
def modelo_forward(x, params):
    """x: (B, 784) float32. params: pre-transposed (in,out) weights, (1,out) biases."""
    B = x.shape[0]

    # Batch tile: multiple of 8 sublanes, capped for VMEM headroom on all gens.
    TB = min(MAX_TB, _round_up(B, 8))
    B_pad = _round_up(B, TB)

    # Inputs: bf16 activations/weights, f32 biases. Pad layer-3 params to 128 lanes.
    x_p = x.astype(jnp.bfloat16)
    if B_pad != B:
        x_p = jnp.pad(x_p, ((0, B_pad - B), (0, 0)))

    w1 = params["w1"].astype(jnp.bfloat16)
    b1 = params["b1"].astype(jnp.float32)
    w2 = params["w2"].astype(jnp.bfloat16)
    b2 = params["b2"].astype(jnp.float32)
    w3 = jnp.pad(params["w3"], ((0, 0), (0, OUT_PAD - OUT_DIM))).astype(jnp.bfloat16)
    b3 = jnp.pad(params["b3"], ((0, 0), (0, OUT_PAD - OUT_DIM))).astype(jnp.float32)

    grid = (B_pad // TB,)

    # Weights/biases: same block every grid step -> stay VMEM-resident (no re-DMA).
    def resident(shape):
        return pl.BlockSpec(shape, lambda i, _n=len(shape): (0,) * _n)

    flops = 2 * B_pad * (IN_DIM * H1 + H1 * H2 + H2 * OUT_PAD)
    bytes_accessed = (
        B_pad * IN_DIM * 2                                   # bf16 x in
        + B_pad * OUT_PAD * 4                                # f32 out
        + (IN_DIM * H1 + H1 * H2 + H2 * OUT_PAD) * 2         # bf16 weights
        + (H1 + H2 + OUT_PAD) * 4                            # f32 biases
    )
    cost = pl.CostEstimate(flops=flops,
                           transcendentals=B_pad * OUT_PAD,
                           bytes_accessed=bytes_accessed)

    out = pl.pallas_call(
        mlp_kernel,
        out_shape=jax.ShapeDtypeStruct((B_pad, OUT_PAD), jnp.float32),
        grid=grid,
        in_specs=[
            pl.BlockSpec((TB, IN_DIM), lambda i: (i, 0)),    # batch-tiled x stream
            resident((IN_DIM, H1)), resident((1, H1)),
            resident((H1, H2)),     resident((1, H2)),
            resident((H2, OUT_PAD)), resident((1, OUT_PAD)),
        ],
        out_specs=pl.BlockSpec((TB, OUT_PAD), lambda i: (i, 0)),
        compiler_params=pltpu.CompilerParams(
            dimension_semantics=("parallel",),               # shard batch across TCs (v7x)
            vmem_limit_bytes=32 * 1024 * 1024,               # safe on v5e/v6e/v7x
        ),
        cost_estimate=cost,
    )(x_p, w1, b1, w2, b2, w3, b3)

    return out[:B, :OUT_DIM]


def init_params(key):
    """Mimics nn.Linear default init (uniform +/- 1/sqrt(fan_in)).
    Weights stored transposed: (in_features, out_features); biases (1, out)."""
    def linear(key, fan_in, fan_out):
        kw, kb = jax.random.split(key)
        bound = 1.0 / jnp.sqrt(fan_in)
        w = jax.random.uniform(kw, (fan_in, fan_out), jnp.float32, -bound, bound)
        b = jax.random.uniform(kb, (1, fan_out), jnp.float32, -bound, bound)
        return w, b

    k1, k2, k3 = jax.random.split(key, 3)
    w1, b1 = linear(k1, IN_DIM, H1)
    w2, b2 = linear(k2, H1, H2)
    w3, b3 = linear(k3, H2, OUT_DIM)
    return {"w1": w1, "b1": b1, "w2": w2, "b2": b2, "w3": w3, "b3": b3}


def reference_forward(x, params, matmul_dtype=jnp.float32):
    """Pure-JAX reference. matmul_dtype=bf16 reproduces the kernel's precision."""
    def mm(a, w):
        return jnp.dot(a.astype(matmul_dtype), w.astype(matmul_dtype),
                       preferred_element_type=jnp.float32)
    h1 = jnp.maximum(mm(x, params["w1"]) + params["b1"], 0.0)
    h2 = jnp.maximum(mm(h1, params["w2"]) + params["b2"], 0.0)
    logits = mm(h2, params["w3"]) + params["b3"]
    return jax.nn.log_softmax(logits, axis=1)


if __name__ == "__main__":
    key = jax.random.PRNGKey(0)
    kx, kp = jax.random.split(key)

    B = 8  # small batch
    x = jax.random.normal(kx, (B, IN_DIM), dtype=jnp.float32)
    params = init_params(kp)

    out = modelo_forward(x, params)
    out = jax.block_until_ready(out)

    assert out.shape == (B, OUT_DIM)

    # sanity: log_softmax rows exp-sum to ~1
    row_sums = jnp.sum(jnp.exp(out), axis=1)
    assert bool(jnp.all(jnp.abs(row_sums - 1.0) < 1e-3)), "rows do not sum to 1"

    # tight check against precision-matched (bf16 matmul inputs) reference
    ref_bf16 = reference_forward(x, params, matmul_dtype=jnp.bfloat16)
    assert bool(jnp.all(jnp.abs(out - ref_bf16) < 2e-3)), "mismatch vs bf16-matched ref"

    # loose check against full-f32 reference (bf16 input truncation error)
    ref_f32 = reference_forward(x, params, matmul_dtype=jnp.float32)
    assert bool(jnp.all(jnp.abs(out - ref_f32) < 1e-1)), "mismatch vs f32 ref"

    print("KERNEL_OK")
</pallas_src>

<mosaic_0001>
module attributes {stable_mosaic.version = 11 : i64} {
  func.func @mlp_kernel(%arg0: i32, %arg1: memref<8x784xbf16, #tpu.memory_space<vmem>>, %arg2: memref<784x128xbf16, #tpu.memory_space<vmem>>, %arg3: memref<1x128xf32, #tpu.memory_space<vmem>>, %arg4: memref<128x64xbf16, #tpu.memory_space<vmem>>, %arg5: memref<1x64xf32, #tpu.memory_space<vmem>>, %arg6: memref<64x128xbf16, #tpu.memory_space<vmem>>, %arg7: memref<1x128xf32, #tpu.memory_space<vmem>>, %arg8: memref<8x128xf32, #tpu.memory_space<vmem>>) attributes {dimension_semantics = [#tpu.dimension_semantics<parallel>], iteration_bounds = array<i64: 1>, scalar_prefetch = 0 : i64, scratch_operands = 0 : i64, tpu.core_type = #tpu.core_type<tc>, window_params = [{transform_indices = @transform_0, window_bounds = array<i64: 8, 784>}, {pipeline_mode = #tpu.pipeline_mode<synchronous>, transform_indices = @transform_1, window_bounds = array<i64: 784, 128>}, {pipeline_mode = #tpu.pipeline_mode<synchronous>, transform_indices = @transform_2, window_bounds = array<i64: 1, 128>}, {pipeline_mode = #tpu.pipeline_mode<synchronous>, transform_indices = @transform_3, window_bounds = array<i64: 128, 64>}, {pipeline_mode = #tpu.pipeline_mode<synchronous>, transform_indices = @transform_4, window_bounds = array<i64: 1, 64>}, {pipeline_mode = #tpu.pipeline_mode<synchronous>, transform_indices = @transform_5, window_bounds = array<i64: 64, 128>}, {pipeline_mode = #tpu.pipeline_mode<synchronous>, transform_indices = @transform_6, window_bounds = array<i64: 1, 128>}, {transform_indices = @transform_7, window_bounds = array<i64: 8, 128>}]} {
    %c0 = arith.constant 0 : index
    %c0_0 = arith.constant 0 : index
    %0 = vector.load %arg1[%c0, %c0_0] : memref<8x784xbf16, #tpu.memory_space<vmem>>, vector<8x784xbf16>
    %c0_1 = arith.constant 0 : index
    %c0_2 = arith.constant 0 : index
    %1 = vector.load %arg2[%c0_1, %c0_2] : memref<784x128xbf16, #tpu.memory_space<vmem>>, vector<784x128xbf16>
    %cst = arith.constant dense<0.000000e+00> : vector<8x128xf32>
    %2 = tpu.matmul %0, %1, %cst {dimension_numbers = #tpu.dot_dimension_numbers<[1], [0], [0], [1], [0, 0, 1, 1], [], []>} : vector<8x784xbf16>, vector<784x128xbf16>, vector<8x128xf32> -> vector<8x128xf32>
    %c0_3 = arith.constant 0 : index
    %c0_4 = arith.constant 0 : index
    %3 = vector.load %arg3[%c0_3, %c0_4] : memref<1x128xf32, #tpu.memory_space<vmem>>, vector<1x128xf32>
    %4 = vector.broadcast %3 : vector<1x128xf32> to vector<8x128xf32>
    %5 = arith.addf %2, %4 : vector<8x128xf32>
    %cst_5 = arith.constant 0.000000e+00 : f32
    %6 = vector.broadcast %cst_5 : f32 to vector<8x128xf32>
    %7 = arith.maximumf %5, %6 : vector<8x128xf32>
    %8 = arith.truncf %7 : vector<8x128xf32> to vector<8x128xbf16>
    %c0_6 = arith.constant 0 : index
    %c0_7 = arith.constant 0 : index
    %9 = vector.load %arg4[%c0_6, %c0_7] : memref<128x64xbf16, #tpu.memory_space<vmem>>, vector<128x64xbf16>
    %cst_8 = arith.constant dense<0.000000e+00> : vector<8x64xf32>
    %10 = tpu.matmul %8, %9, %cst_8 {dimension_numbers = #tpu.dot_dimension_numbers<[1], [0], [0], [1], [0, 0, 1, 1], [], []>} : vector<8x128xbf16>, vector<128x64xbf16>, vector<8x64xf32> -> vector<8x64xf32>
    %c0_9 = arith.constant 0 : index
    %c0_10 = arith.constant 0 : index
    %11 = vector.load %arg5[%c0_9, %c0_10] : memref<1x64xf32, #tpu.memory_space<vmem>>, vector<1x64xf32>
    %12 = vector.broadcast %11 : vector<1x64xf32> to vector<8x64xf32>
    %13 = arith.addf %10, %12 : vector<8x64xf32>
    %cst_11 = arith.constant 0.000000e+00 : f32
    %14 = vector.broadcast %cst_11 : f32 to vector<8x64xf32>
    %15 = arith.maximumf %13, %14 : vector<8x64xf32>
    %16 = arith.truncf %15 : vector<8x64xf32> to vector<8x64xbf16>
    %c0_12 = arith.constant 0 : index
    %c0_13 = arith.constant 0 : index
    %17 = vector.load %arg6[%c0_12, %c0_13] : memref<64x128xbf16, #tpu.memory_space<vmem>>, vector<64x128xbf16>
    %cst_14 = arith.constant dense<0.000000e+00> : vector<8x128xf32>
    %18 = tpu.matmul %16, %17, %cst_14 {dimension_numbers = #tpu.dot_dimension_numbers<[1], [0], [0], [1], [0, 0, 1, 1], [], []>} : vector<8x64xbf16>, vector<64x128xbf16>, vector<8x128xf32> -> vector<8x128xf32>
    %c0_15 = arith.constant 0 : index
    %c0_16 = arith.constant 0 : index
    %19 = vector.load %arg7[%c0_15, %c0_16] : memref<1x128xf32, #tpu.memory_space<vmem>>, vector<1x128xf32>
    %20 = vector.broadcast %19 : vector<1x128xf32> to vector<8x128xf32>
    %21 = arith.addf %18, %20 : vector<8x128xf32>
    %22 = tpu.iota {dimensions = array<i32: 1>} : vector<8x128xi32>
    %c10_i32 = arith.constant 10 : i32
    %23 = vector.broadcast %c10_i32 : i32 to vector<8x128xi32>
    %24 = arith.cmpi slt, %22, %23 : vector<8x128xi32>
    %cst_17 = arith.constant -1.000000e+30 : f32
    %25 = vector.broadcast %cst_17 : f32 to vector<8x128xf32>
    %26 = arith.select %24, %21, %25 : vector<8x128xi1>, vector<8x128xf32>
    %cst_18 = arith.constant dense<0xFF800000> : vector<8xf32>
    %27 = vector.multi_reduction <maximumf>, %26, %cst_18 [1] : vector<8x128xf32> to vector<8xf32>
    %28 = vector.shape_cast %27 : vector<8xf32> to vector<8x1xf32>
    %29 = vector.broadcast %28 : vector<8x1xf32> to vector<8x128xf32>
    %30 = arith.subf %26, %29 : vector<8x128xf32>
    %31 = math.exp %30 : vector<8x128xf32>
    %cst_19 = arith.constant dense<0.000000e+00> : vector<8xf32>
    %32 = vector.multi_reduction <add>, %31, %cst_19 [1] : vector<8x128xf32> to vector<8xf32>
    %33 = vector.shape_cast %32 : vector<8xf32> to vector<8x1xf32>
    %34 = math.log %33 : vector<8x1xf32>
    %35 = vector.broadcast %34 : vector<8x1xf32> to vector<8x128xf32>
    %36 = arith.subf %30, %35 : vector<8x128xf32>
    %c0_20 = arith.constant 0 : index
    %c0_21 = arith.constant 0 : index
    %37 = vector.load %arg8[%c0_20, %c0_21] : memref<8x128xf32, #tpu.memory_space<vmem>>, vector<8x128xf32>
    tpu.vector_store %arg8[%c0_20, %c0_21], %36 {strides = array<i32>} : memref<8x128xf32, #tpu.memory_space<vmem>>, vector<8x128xf32>,
    return
  }
  func.func @transform_0(%arg0: i32) -> (i32, i32) {
    %c0_i32 = arith.constant 0 : i32
    %c0_i32_0 = arith.constant 0 : i32
    return %arg0, %c0_i32 : i32, i32
  }
  func.func @transform_1(%arg0: i32) -> (i32, i32) {
    %c0_i32 = arith.constant 0 : i32
    %c0_i32_0 = arith.constant 0 : i32
    %c0_i32_1 = arith.constant 0 : i32
    return %c0_i32, %c0_i32_0 : i32, i32
  }
  func.func @transform_2(%arg0: i32) -> (i32, i32) {
    %c0_i32 = arith.constant 0 : i32
    %c0_i32_0 = arith.constant 0 : i32
    %c0_i32_1 = arith.constant 0 : i32
    return %c0_i32, %c0_i32_0 : i32, i32
  }
  func.func @transform_3(%arg0: i32) -> (i32, i32) {
    %c0_i32 = arith.constant 0 : i32
    %c0_i32_0 = arith.constant 0 : i32
    %c0_i32_1 = arith.constant 0 : i32
    return %c0_i32, %c0_i32_0 : i32, i32
  }
  func.func @transform_4(%arg0: i32) -> (i32, i32) {
    %c0_i32 = arith.constant 0 : i32
    %c0_i32_0 = arith.constant 0 : i32
    %c0_i32_1 = arith.constant 0 : i32
    return %c0_i32, %c0_i32_0 : i32, i32
  }
  func.func @transform_5(%arg0: i32) -> (i32, i32) {
    %c0_i32 = arith.constant 0 : i32
    %c0_i32_0 = arith.constant 0 : i32
    %c0_i32_1 = arith.constant 0 : i32
    return %c0_i32, %c0_i32_0 : i32, i32
  }
  func.func @transform_6(%arg0: i32) -> (i32, i32) {
    %c0_i32 = arith.constant 0 : i32
    %c0_i32_0 = arith.constant 0 : i32
    %c0_i32_1 = arith.constant 0 : i32
    return %c0_i32, %c0_i32_0 : i32, i32
  }
  func.func @transform_7(%arg0: i32) -> (i32, i32) {
    %c0_i32 = arith.constant 0 : i32
    %c0_i32_0 = arith.constant 0 : i32
    return %arg0, %c0_i32 : i32, i32
  }
}

</mosaic_0001>

<bundles_post_ra>
// kernel: modelo_forward.1
= control target key start
LH: loop header
LB: loop body
LE: loop exit
PB: predicated region body
PF: predicated region fallthrough
CT: control target
= control target key end

     0   :  { %v1136_v43 = vmov 0.0   ;;  %vm1137_vm0 = vmmov 0   ;;  %vm455_vm1 = vcmask 130048   ;;  %s1405_s0 = inlined_call_operand.vmem [shape: bf16[8,784], index: 0, kind: input, shape index: {}]   ;;  %s1406_s1 = inlined_call_operand.vmem [shape: bf16[784,128], index: 1, kind: input, shape index: {}]   ;;  %s1407_s2 = inlined_call_operand.vmem [shape: f32[1,128], index: 2, kind: input, shape index: {}]   ;;  %s1408_s3 = inlined_call_operand.vmem [shape: bf16[128,64], index: 3, kind: input, shape index: {}]   ;;  %s1409_s4 = inlined_call_operand.vmem [shape: f32[1,64], index: 4, kind: input, shape index: {}]   ;;  %s1410_s5 = inlined_call_operand.vmem [shape: bf16[64,128], index: 5, kind: input, shape index: {}]   ;;  %s1411_s6 = inlined_call_operand.vmem [shape: f32[1,128], index: 6, kind: input, shape index: {}]   ;;  %s1412_s7 = inlined_call_operand.hbm [shape: f32[8,128], index: 7, kind: output, shape index: {}]  }
   0x1   :  { %v1042_v0 = vld [vmem:[%s1406_s1 + $0x78] sm:$0xff]   ;;  %v1046_v4 = vld [vmem:[%s1406_s1 + $0x70] sm:$0xff]   ;;  %v1050_v8 = vld [vmem:[%s1406_s1 + $0x68] sm:$0xff]  }
   0x2   :  { %v1043_v1 = vld [vmem:[%s1406_s1 + $0x38] sm:$0xff]   ;;  %919 = vmatprep.subr.bf16.mxu0 %v1042_v0  ;;  %v1047_v5 = vld [vmem:[%s1406_s1 + $0x30] sm:$0xff]   ;;  %v1051_v9 = vld [vmem:[%s1406_s1 + $0x28] sm:$0xff]  }
   0x3   :  { %v1044_v2 = vld [vmem:[%s1406_s1 + $0xf8] sm:$0xff]   ;;  %920 = vmatpush3.bf16.msra.mxu0 %v1043_v1  ;;  %v1048_v6 = vld [vmem:[%s1406_s1 + $0xf0] sm:$0xff]   ;;  %v1052_v10 = vld [vmem:[%s1406_s1 + $0xe8] sm:$0xff]  }
   0x4   :  { %v1045_v3 = vld [vmem:[%s1406_s1 + $0xb8] sm:$0xff]   ;;  %941 = vmatprep.subr.bf16.mxu1 %v1044_v2  ;;  %921 = vmatprep.subr.bf16.mxu0 %v1046_v4  ;;  %v1049_v7 = vld [vmem:[%s1406_s1 + $0xb0] sm:$0xff]   ;;  %v1053_v11 = vld [vmem:[%s1406_s1 + $0xa8] sm:$0xff]  }
   0x5   :  { %942 = vmatpush3.bf16.msra.mxu1 %v1045_v3  ;;  %v1054_v12 = vld [vmem:[%s1406_s1 + $0x60] sm:$0xff]   ;;  %v1058_v16 = vld [vmem:[%s1406_s1 + $0x58] sm:$0xff]   ;;  %v1062_v20 = vld [vmem:[%s1406_s1 + $0x50] sm:$0xff]  }
   0x6   :  { %943 = vmatprep.subr.bf16.mxu1 %v1048_v6  ;;  %v1055_v13 = vld [vmem:[%s1406_s1 + $0x20] sm:$0xff]   ;;  %v1059_v17 = vld [vmem:[%s1406_s1 + $0x18] sm:$0xff]   ;;  %v1063_v21 = vld [vmem:[%s1406_s1 + $0x10] sm:$0xff]  }
   0x7   :  { %922 = vmatpush3.bf16.msra.mxu0 %v1047_v5  ;;  %v1056_v14 = vld [vmem:[%s1406_s1 + $0xe0] sm:$0xff]   ;;  %v1060_v18 = vld [vmem:[%s1406_s1 + $0xd8] sm:$0xff]   ;;  %v1064_v22 = vld [vmem:[%s1406_s1 + $0xd0] sm:$0xff]  }
   0x8   :  { %923 = vmatprep.subr.bf16.mxu0 %v1050_v8  ;;  %v1057_v15 = vld [vmem:[%s1406_s1 + $0xa0] sm:$0xff]   ;;  %v1061_v19 = vld [vmem:[%s1406_s1 + $0x98] sm:$0xff]   ;;  %v1065_v23 = vld [vmem:[%s1406_s1 + $0x90] sm:$0xff]  }
   0x9   :  { %944 = vmatpush3.bf16.msra.mxu1 %v1049_v7  ;;  %v1066_v24 = vld [vmem:[%s1406_s1 + $0x48] sm:$0xff]   ;;  %v1070_v28 = vld [vmem:[%s1406_s1 + $0x40] sm:$0xff]   ;;  %v1076_v35 = vld [vmem:[%s1406_s1 + $0x178] sm:$0xff]  }
   0xa   :  { %945 = vmatprep.subr.bf16.mxu1 %v1052_v10  ;;  %v1067_v25 = vld [vmem:[%s1406_s1 + $0x8] sm:$0xff]   ;;  %v1071_v29 = vld [vmem:[%s1406_s1] sm:$0xff]   ;;  %v1079_v39 = vld [vmem:[%s1406_s1 + $0x138] sm:$0xff]  }
   0xb   :  { %924 = vmatpush3.bf16.msra.mxu0 %v1051_v9  ;;  %v1068_v26 = vld [vmem:[%s1406_s1 + $0xc8] sm:$0xff]   ;;  %v1072_v30 = vld [vmem:[%s1406_s1 + $0xc0] sm:$0xff]   ;;  %v1080_v40 = vld [vmem:[%s1406_s1 + $0x170] sm:$0xff]  }
   0xc   :  { %925 = vmatprep.subr.bf16.mxu0 %v1054_v12  ;;  %v1069_v27 = vld [vmem:[%s1406_s1 + $0x88] sm:$0xff]   ;;  %v28_v31 = vld [vmem:[%s1405_s0] sm:$0xff]  ;;  %v1081_v41 = vld [vmem:[%s1406_s1 + $0x130] sm:$0xff]  }
   0xd   :  { %946 = vmatpush3.bf16.msra.mxu1 %v1053_v11  ;;  %v847_v32 = vcombine.low %v28_v31, %v28_v31  ;;  %v848_v33 = vcombine.high %v28_v31, %v28_v31  ;;  %v1075_v34 = vld [vmem:[%s1406_s1 + $0x80] sm:$0xff]   ;;  %v29_v36 = vld [vmem:[%s1405_s0 + $0x8] sm:$0xff]  ;;  %v1086_v47 = vld [vmem:[%s1406_s1 + $0x158] sm:$0xff]  }
   0xe   :  { %947 = vmatprep.subr.bf16.mxu1 %v1056_v14  ;;  %v849_v37 = vcombine.low %v29_v36, %v29_v36  ;;  %v850_v38 = vcombine.high %v29_v36, %v29_v36  ;;  %v1082_v42 = vld [vmem:[%s1406_s1 + $0x168] sm:$0xff]   ;;  %v1084_v45 = vld [vmem:[%s1406_s1 + $0x160] sm:$0xff]   ;;  %v1087_v48 = vld [vmem:[%s1406_s1 + $0x118] sm:$0xff]  }
   0xf   :  { %926 = vmatpush3.bf16.msra.mxu0 %v1055_v13  ;;  %491 = vmatprep.mubr.bf16.mxu0 %v848_v33  ;;  %v1083_v44 = vld [vmem:[%s1406_s1 + $0x128] sm:$0xff]   ;;  %v1085_v46 = vld [vmem:[%s1406_s1 + $0x120] sm:$0xff]   ;;  %v1088_v49 = vld [vmem:[%s1406_s1 + $0x150] sm:$0xff]  }
  0x10   :  { %927 = vmatprep.subr.bf16.mxu0 %v1058_v16  ;;  %531 = vmatprep.mubr.bf16.mxu1 %v850_v38  ;;  %v1094_v50 = vld [vmem:[%s1406_s1 + $0x180] sm:$0xff]   ;;  %v30_v51 = vld [vmem:[%s1405_s0 + $0x10] sm:$0xff]  ;;  %v1097_v54 = vld [vmem:[%s1405_s0 + $0x18] ss:$0 sps:$4 sm:$0xff]  }
  0x11   :  { %948 = vmatpush3.bf16.msra.mxu1 %v1057_v15  ;;  %v1089_v52 = vld [vmem:[%s1406_s1 + $0x110] sm:$0xff]   ;;  %v852_v53 = vcombine.high %v30_v51, %v30_v51  ;;  %v1090_v55 = vld [vmem:[%s1406_s1 + $0x148] sm:$0xff]   ;;  %v1092_v57 = vld [vmem:[%s1406_s1 + $0x140] sm:$0xff]  }
  0x12   :  { %949 = vmatprep.subr.bf16.mxu1 %v1060_v18  ;;  %v1091_v56 = vld [vmem:[%s1406_s1 + $0x108] sm:$0xff]  }
  0x13   :  { %928 = vmatpush3.bf16.msra.mxu0 %v1059_v17 }
  0x14   :  { %929 = vmatprep.subr.bf16.mxu0 %v1062_v20 }
  0x15   :  { %950 = vmatpush3.bf16.msra.mxu1 %v1061_v19 }
  0x16   :  { %951 = vmatprep.subr.bf16.mxu1 %v1064_v22 }
  0x17   :  { %930 = vmatpush3.bf16.msra.mxu0 %v1063_v21 }
  0x18   :  { %931 = vmatprep.subr.bf16.mxu0 %v1066_v24 }
  0x19   :  { %952 = vmatpush3.bf16.msra.mxu1 %v1065_v23 }
  0x1a   :  { %953 = vmatprep.subr.bf16.mxu1 %v1068_v26 }
  0x1b   :  { %932 = vmatpush3.bf16.msra.mxu0 %v1067_v25 }
  0x1c   :  { %933 = vmatprep.subr.bf16.mxu0 %v1070_v28 }
  0x1d   :  { %954 = vmatpush3.bf16.msra.mxu1 %v1069_v27 }
  0x1e   :  { %955 = vmatprep.subr.bf16.mxu1 %v1072_v30 }
  0x1f   :  { %934 = vmatpush3.bf16.msra.mxu0 %v1071_v29 }
  0x20   :  { %963 = vmatprep.subr.bf16.mxu0 %v1076_v35 }
  0x21   :  { %956 = vmatpush3.bf16.msra.mxu1 %v1075_v34 }
  0x22   :  { %492 = vmatmul.mubr.bf16.vlgmr.msra.gmra.mxu0 %v847_v32  ;;  %1001 = vmatprep.subr.bf16.mxu1 %v1136_v43 }
  0x23   :  { %964 = vmatpush3.bf16.msra.mxu0 %v1079_v39  ;;  %571 = vmatprep.mubr.bf16.mxu0 %v852_v53 }
  0x24   :  { %532 = vmatmul.mubr.bf16.vlgmr.msra.gmra.mxu1 %v849_v37  ;;  %965 = vmatprep.subr.bf16.mxu0 %v1080_v40 }
  0x25   :  { %1003 = vmatprep.mubr.msk.bf16.mxu1 %vm1137_vm0, %v1136_v43  ;;  %1002 = vmatpush3.bf16.msra.mxu1 %v1094_v50 }
  0x26   :  { %1007 = vmatprep.subr.bf16.mxu1 %v1136_v43 }
  0x27   :  { %966 = vmatpush3.bf16.msra.mxu0 %v1081_v41 }
  0x28   :  { %967 = vmatprep.subr.bf16.mxu0 %v1082_v42 }
  0x2b   :  { %968 = vmatpush3.bf16.msra.mxu0 %v1083_v44 }
  0x2c   :  { %969 = vmatprep.subr.bf16.mxu0 %v1084_v45  ;;  %1004 = vmatmul.mubr.msk.bf16.vlgmr.msra.gmra.mxu1 %vm455_vm1, %v1097_v54 }
  0x2d   :  { %1023 = vmatprep.mubr.msk.bf16.mxu1 %vm1137_vm0, %v1136_v43 }
  0x2f   :  { %970 = vmatpush3.bf16.msra.mxu0 %v1085_v46 }
  0x30   :  { %971 = vmatprep.subr.bf16.mxu0 %v1086_v47 }
  0x33   :  { %972 = vmatpush3.bf16.msra.mxu0 %v1087_v48 }
  0x34   :  { %973 = vmatprep.subr.bf16.mxu0 %v1088_v49 }
  0x37   :  { %974 = vmatpush3.bf16.msra.mxu0 %v1089_v52 }
  0x38   :  { %975 = vmatprep.subr.bf16.mxu0 %v1090_v55 }
  0x39   :  { %12 = vsyncpa [#allocation3], 0  ;;  %v1093_v58 = vld [vmem:[%s1406_s1 + $0x100] sm:$0xff]   ;;  %v851_v59 = vcombine.low %v30_v51, %v30_v51  ;;  %v1098_v60 = vld [vmem:[%s1408_s3 + $0x38] sm:$0xff]   ;;  %vm773_vm2 = vcmask 523264   ;;  %v817_v42 = vlaneseq }
  0x3a   :  { %1008 = vmatpush3.bf16.msra.mxu1 %v1098_v60  ;;  %v1099_v61 = vld [vmem:[%s1408_s3 + $0x30] sm:$0xff]   ;;  %v1100_v62 = vld [vmem:[%s1408_s3 + $0x28] sm:$0xff]   ;;  %v1101_v63 = vld [vmem:[%s1408_s3 + $0x20] sm:$0xff]  }
  0x3b   :  { %976 = vmatpush3.bf16.msra.mxu0 %v1091_v56  ;;  %1009 = vmatprep.subr.bf16.mxu1 %v1136_v43  ;;  %v1102_v0 = vld [vmem:[%s1408_s3 + $0x18] sm:$0xff]   ;;  %v1103_v1 = vld [vmem:[%s1408_s3 + $0x10] sm:$0xff]   ;;  %v1104_v2 = vld [vmem:[%s1408_s3 + $0x8] sm:$0xff]  }
  0x3c   :  { %977 = vmatprep.subr.bf16.mxu0 %v1092_v57  ;;  %v1105_v3 = vld [vmem:[%s1408_s3] sm:$0xff]   ;;  %v1106_v4 = vld [vmem:[%s1410_s5 + $0x18] sm:$0xff]   ;;  %v1107_v5 = vld [vmem:[%s1410_s5 + $0x10] sm:$0xff]  }
  0x3d   :  { %v846_v19 = vld [vmem:[%s1407_s2] ss:$0 sm:$0xff]  ;;  %v1108_v32 = vld [vmem:[%s1410_s5 + $0x8] sm:$0xff]  }
  0x3e   :  { %1010 = vmatpush3.bf16.msra.mxu1 %v1099_v61  ;;  %v1109_v33 = vld [vmem:[%s1410_s5] sm:$0xff]  }
  0x3f   :  { %978 = vmatpush3.bf16.msra.mxu0 %v1093_v58  ;;  %1011 = vmatprep.subr.bf16.mxu1 %v1136_v43  ;;  %v904_v34 = vld [vmem:[%s1409_s4] ss:$0 sm:$0xff]  ;;  %s1138_s4 = smov [#allocation2]  }
  0x40   :  { %1027 = vmatprep.subr.bf16.mxu0 %v1136_v43  ;;  %v913_v44 = vld [vmem:[%s1411_s6] ss:$0 sm:$0xff]  ;;  %s838_s5 = sshll.u32 %s1138_s4, 4  ;;  %s839_s5 = int_to_ptr.vmem [resolvable:$true] %s838_s5 }
  0x41   :  { %s1114_s6 = scalar_lea.vmem %s839_s5, 128  ;;  %p1119_p1 = scmp.lt.s32.totalorder %s839_s5, %s839_s5 }
  0x42   :  { %572 = vmatmul.mubr.bf16.vlgmr.msra.gmra.mxu0 %v851_v59  ;;  %1012 = vmatpush3.bf16.msra.mxu1 %v1100_v62  ;;  %p1115_p0 = scmp.ne.s32.totalorder %s839_s5, %s1114_s6  ;;  %p1120_p2 = scmp.lt.s32.totalorder %s1114_s6, %s1114_s6 }
  0x43   :  { %1035 = vmatprep.mubr.msk.bf16.mxu0 %vm1137_vm0, %v1136_v43  ;;  %1013 = vmatprep.subr.bf16.mxu1 %v1136_v43 }
  0x44   :  { %1028 = vmatpush3.bf16.msra.mxu0 %v1106_v4  ;;  %p1121_p3 = por %p1120_p2, %p1119_p1 }
  0x45   :  { %1029 = vmatprep.subr.bf16.mxu0 %v1136_v43 }
  0x46   :  { %1014 = vmatpush3.bf16.msra.mxu1 %v1101_v63  ;;  %p1122_p4 = pnand %p1121_p3, %p1115_p0 }
  0x47   :  { %1015 = vmatprep.subr.bf16.mxu1 %v1136_v43 }
  0x48   :  { %1030 = vmatpush3.bf16.msra.mxu0 %v1107_v5 }
  0x49   :  { %1031 = vmatprep.subr.bf16.mxu0 %v1136_v43 }
  0x4a   :  { %1016 = vmatpush3.bf16.msra.mxu1 %v1102_v0 }
  0x4b   :  { %1017 = vmatprep.subr.bf16.mxu1 %v1136_v43 }
  0x4c   :  { %1032 = vmatpush3.bf16.msra.mxu0 %v1108_v32 }
  0x4d   :  { %1033 = vmatprep.subr.bf16.mxu0 %v1136_v43 }
  0x4e   :  { %1018 = vmatpush3.bf16.msra.mxu1 %v1103_v1 }
  0x4f   :  { %1019 = vmatprep.subr.bf16.mxu1 %v1136_v43 }
  0x50   :  { %1034 = vmatpush3.bf16.msra.mxu0 %v1109_v33 }
  0x52   :  { %1020 = vmatpush3.bf16.msra.mxu1 %v1104_v2 }
  0x53   :  { %1021 = vmatprep.subr.bf16.mxu1 %v1136_v43  ;;  %v818_v43 = vand.u32 127, %v817_v42 }
  0x55   :  { %vm819_vm3 = vcmp.lt.s32.totalorder %v818_v43, 10 }
  0x56   :  { %1022 = vmatpush3.bf16.msra.mxu1 %v1105_v3 }
  0xe2   :  { %v935_v6 = vpop.f32.mrf.mxu0 }
  0xe4   :  { %v936_v7 = vpop.f32.mrf.mxu0  ;;  %v957_v8 = vpop.f32.mrf.mxu1 }
  0xe5   :  { %v937_v18 = vadd.f32 %v936_v7, %v935_v6 }
  0xe6   :  { %v938_v9 = vpop.f32.mrf.mxu0  ;;  %v958_v10 = vpop.f32.mrf.mxu1 }
  0xe7   :  { %v494_v20 = vadd.f32 %v937_v18, %v846_v19  ;;  %v959_v21 = vadd.f32 %v958_v10, %v957_v8 }
  0xe8   :  { %v939_v11 = vpop.f32.mrf.mxu0  ;;  %v960_v12 = vpop.f32.mrf.mxu1 }
  0xe9   :  { %v534_v24 = vadd.f32 %v959_v21, %v494_v20 }
  0xea   :  { %v961_v13 = vpop.f32.mrf.mxu1 }
  0xec   :  { %v613_v14 = vpop.f32.mrf.mxu1 }
  0xee   :  { %v1005_v15 = vpop.f32.mrf.mxu1 }
  0xf0   :  { %v616_v16 = vpop.f32.mrf.mxu1 }
  0xf2   :  { %v1006_v17 = vpop.f32.mrf.mxu1 }
 0x102   :  { %v979_v22 = vpop.f32.mrf.mxu0 }
 0x104   :  { %v980_v23 = vpop.f32.mrf.mxu0 }
 0x105   :  { %v981_v25 = vadd.f32 %v980_v23, %v979_v22 }
 0x106   :  { %v982_v26 = vpop.f32.mrf.mxu0 }
 0x107   :  { %v574_v27 = vadd.f32 %v981_v25, %v534_v24 }
 0x108   :  { %v983_v28 = vpop.f32.mrf.mxu0 }
 0x109   :  { %v614_v29 = vadd.f32 %v613_v14, %v574_v27 }
 0x10b   :  { %v619_v30 = vmax.f32 %v614_v29, 0.0 }
 0x10d   :  { %v620_v31 = vpack.c.bf16 %v619_v30, %v619_v30 }
 0x10f   :  { %1024 = vmatmul.mubr.bf16.vlgmr.msra.gmra.mxu1 %v620_v31 }
 0x1cf   :  { %v726_v35 = vpop.f32.mrf.mxu1 }
 0x1d0   :  { %v727_v36 = vadd.f32 %v904_v34, %v726_v35 }
 0x1d1   :  { %v1025_v37 = vpop.f32.mrf.mxu1 }
 0x1d2   :  { %v732_v38 = vmax.f32 %v727_v36, 0.0 }
 0x1d3   :  { %v729_v39 = vpop.f32.mrf.mxu1 }
 0x1d4   :  { %v733_v40 = vpack.c.bf16 %v732_v38, %v732_v38 }
 0x1d5   :  { %v1026_v41 = vpop.f32.mrf.mxu1 }
 0x1d6   :  { %1036 = vmatmul.mubr.msk.bf16.vlgmr.msra.gmra.mxu0 %vm773_vm2, %v733_v40 }
 0x296   :  { %v811_v45 = vpop.f32.mrf.mxu0 }
 0x297   :  { %v812_v46 = vadd.f32 %v913_v44, %v811_v45 }
 0x298   :  { %v1037_v47 = vpop.f32.mrf.mxu0 }
 0x299   :  { %v820_v48 = vsel %vm819_vm3, %v812_v46, -1e+30 }
 0x29a   :  { %821 = vmax.xlane.f32.xlu0 %v820_v48  ;;  %v814_v49 = vpop.f32.mrf.mxu0 }
 0x29c   :  { %v1038_v50 = vpop.f32.mrf.mxu0 }
 0x323   :  { %v822_v51 = vpop.xlane.xlu0 %821 }
 0x324   :  { %v823_v52 = vsub.f32 %v820_v48, %v822_v51 }
 0x326   :  { %v824_v53 = vmul.f32 1.442695, %v823_v52 }
 0x328   :  { %1110 = vpow2.f32 %v824_v53 }
 0x335   :  { %v1111_v54 = vpop.eup %1110 }
 0x336   :  { %826 = vadd.xlane.f32.xlu0 %v1111_v54 }
 0x3bf   :  { %v827_v55 = vpop.xlane.xlu0 %826 }
 0x3c0   :  { %1112 = vlog2.f32 %v827_v55 }
 0x3cd   :  { %v1113_v56 = vpop.eup %1112 }
 0x3ce   :  { %v829_v57 = vmul.f32 0.6931472, %v1113_v56 }
 0x3d0   :  { %v830_v58 = vsub.f32 %v823_v52, %v829_v57 }
 0x3d2   :  { %831 = vst [vmem:[#allocation2] sm:$0xff] %v830_v58 }
 0x3d3   :  { %1125 = shalt.err (!%p1122_p4)
}
 0x3d4   :  { %841 = dma.vmem_to_hbm [thread:$0]  %s839_s5, 128, %s1412_s7, [#allocation3]  }
 0x3d5   :  { %1134 = dma.done.wait [#allocation3], 128  }
 0x3d6   :  { %1135 = vsyncadd [#allocation3], 4294967168 }
 0x3d7   :  { %845 = vsyncpa [#allocation3], 1 }

</bundles_post_ra>
